<compile_context>
chip_gen: v5e
topology: v5e:2x2
jax: 0.10.0
libtpu: 0.0.40
codegen_flags: <defaults>
</compile_context>

<pallas_src>
import functools

import jax
import jax.numpy as jnp
from jax.experimental import pallas as pl
from jax.experimental.pallas import tpu as pltpu

_SUBLANE = 8


def _round_up(v, m):
    return ((v + m - 1) // m) * m


def _fused_classifier_kernel(x_ref, w_ref, b_ref, out_ref):
    """One batch tile: y = x @ W_fused + b_fused, f32 accumulation on the MXU."""
    out_ref[...] = (
        jnp.dot(x_ref[...], w_ref[...], preferred_element_type=jnp.float32)
        + b_ref[...]
    ).astype(out_ref.dtype)


def fuse_params(w1, b1, w2, b2, w3, b3):
    """One-time parameter prep (exact: no activations between the linears).

    Call once after parameter updates; keep the fused weights around so the
    per-call hot path is only the Pallas kernel.
    """
    w_fused = (w1 @ w2) @ w3                 # (C, num_classes)
    b_fused = (b1 @ w2 + b2) @ w3 + b3       # (1, num_classes)
    return w_fused, b_fused


@functools.partial(jax.jit, static_argnames=("block_batch",))
def classifier_forward_fused(x, w_fused, b_fused, *, block_batch=4096):
    """Hot path: y = x @ W_fused + b_fused as a single batch-tiled Pallas call.

    Args:
      x:       (batch, codeword_length) float32
      w_fused: (codeword_length, num_classes) float32
      b_fused: (1, num_classes) float32
      block_batch: cap on the batch tile (rows per grid step).

    Returns:
      logits: (batch, num_classes) float32
    """
    batch, c = x.shape
    num_classes = w_fused.shape[1]

    # Batch tile: multiple of 8 sublanes, capped at block_batch; when the
    # batch is large enough, cap at ~half the batch so the grid has >= 2
    # steps and the "parallel" axis actually shards across both TCs (v7x).
    half = _round_up(max((batch + 1) // 2, 1), _SUBLANE)
    tb = max(_SUBLANE, _round_up(min(block_batch, half), _SUBLANE))

    # Ragged last block: Pallas clamps the block fetch and masks the partial
    # output store, and each output row depends only on its own input row,
    # so no padding of x or slice-back of the output is needed.
    grid = (pl.cdiv(batch, tb),)

    dtype_bytes = x.dtype.itemsize
    out = pl.pallas_call(
        _fused_classifier_kernel,
        out_shape=jax.ShapeDtypeStruct((batch, num_classes), jnp.float32),
        grid_spec=pltpu.PrefetchScalarGridSpec(
            num_scalar_prefetch=0,
            grid=grid,
            in_specs=[
                # x: one (tb, C) tile per grid step — streamed / pipelined.
                pl.BlockSpec((tb, c), lambda i: (i, 0)),
                # fused weight / bias: constant index_map -> stay resident.
                pl.BlockSpec((c, num_classes), lambda i: (0, 0)),
                pl.BlockSpec((1, num_classes), lambda i: (0, 0)),
            ],
            out_specs=pl.BlockSpec((tb, num_classes), lambda i: (i, 0)),
        ),
        compiler_params=pltpu.CompilerParams(
            dimension_semantics=("parallel",),  # shard batch across TCs (v7x)
        ),
        cost_estimate=pl.CostEstimate(
            flops=2 * batch * c * num_classes,
            transcendentals=0,
            bytes_accessed=(batch * c + c * num_classes + num_classes
                            + batch * num_classes) * dtype_bytes,
        ),
    )(x, w_fused, b_fused)
    return out


def classifier_forward(x, w1, b1, w2, b2, w3, b3, *, block_batch=4096):
    """Convenience wrapper: fuse params then run the Pallas hot path."""
    w_fused, b_fused = fuse_params(w1, b1, w2, b2, w3, b3)
    return classifier_forward_fused(x, w_fused, b_fused, block_batch=block_batch)


def init_params(key, codeword_length, num_classes):
    """PyTorch-style default nn.Linear init: U(-1/sqrt(fan_in), 1/sqrt(fan_in)).
    Weights stored as (in, out) so the kernel computes x @ W directly."""
    keys = jax.random.split(key, 6)

    def linear(kw, kb, fan_in, fan_out):
        bound = 1.0 / jnp.sqrt(jnp.float32(fan_in))
        w = jax.random.uniform(kw, (fan_in, fan_out), jnp.float32,
                               minval=-bound, maxval=bound)
        b = jax.random.uniform(kb, (1, fan_out), jnp.float32,
                               minval=-bound, maxval=bound)
        return w, b

    w1, b1 = linear(keys[0], keys[1], codeword_length, 32)
    w2, b2 = linear(keys[2], keys[3], 32, 64)
    w3, b3 = linear(keys[4], keys[5], 64, num_classes)
    return w1, b1, w2, b2, w3, b3


def _reference(x, params):
    w1, b1, w2, b2, w3, b3 = params
    return ((x @ w1 + b1) @ w2 + b2) @ w3 + b3


if __name__ == "__main__":
    codeword_length = 16
    num_classes = 10

    key = jax.random.PRNGKey(0)
    k_x1, k_x2, k_x3, k_p = jax.random.split(key, 4)
    params = init_params(k_p, codeword_length, num_classes)

    # One-time parameter prep (hoisted out of the hot path).
    w_fused, b_fused = fuse_params(*params)

    # Case 1: small, sublane-aligned batch (grid of 2 steps).
    batch = 64
    x = jax.random.normal(k_x1, (batch, codeword_length), jnp.float32)
    logits = jax.block_until_ready(classifier_forward_fused(x, w_fused, b_fused))
    ref = _reference(x, params)
    assert logits.shape == (batch, num_classes)
    assert jnp.allclose(logits, ref, atol=1e-4, rtol=1e-4)

    # Case 2: ragged batch (exercises the masked partial tail block).
    batch2 = 9
    x2 = jax.random.normal(k_x2, (batch2, codeword_length), jnp.float32)
    logits2 = jax.block_until_ready(classifier_forward_fused(x2, w_fused, b_fused))
    ref2 = _reference(x2, params)
    assert logits2.shape == (batch2, num_classes)
    assert jnp.allclose(logits2, ref2, atol=1e-4, rtol=1e-4)

    # Case 3: multi-step grid with a ragged tail.
    batch3 = 257
    x3 = jax.random.normal(k_x3, (batch3, codeword_length), jnp.float32)
    logits3 = jax.block_until_ready(classifier_forward_fused(x3, w_fused, b_fused))
    ref3 = _reference(x3, params)
    assert logits3.shape == (batch3, num_classes)
    assert jnp.allclose(logits3, ref3, atol=1e-4, rtol=1e-4)

    print("KERNEL_OK")
</pallas_src>

<mosaic_0001>
module attributes {stable_mosaic.version = 11 : i64} {
  func.func @_fused_classifier_kernel(%arg0: i32, %arg1: memref<32x16xf32, #tpu.memory_space<vmem>>, %arg2: memref<16x10xf32, #tpu.memory_space<vmem>>, %arg3: memref<1x10xf32, #tpu.memory_space<vmem>>, %arg4: memref<32x10xf32, #tpu.memory_space<vmem>>) attributes {dimension_semantics = [#tpu.dimension_semantics<parallel>], iteration_bounds = array<i64: 2>, scalar_prefetch = 0 : i64, scratch_operands = 0 : i64, tpu.core_type = #tpu.core_type<tc>, window_params = [{transform_indices = @transform_0, window_bounds = array<i64: 32, 16>}, {pipeline_mode = #tpu.pipeline_mode<synchronous>, transform_indices = @transform_1, window_bounds = array<i64: 16, 10>}, {pipeline_mode = #tpu.pipeline_mode<synchronous>, transform_indices = @transform_2, window_bounds = array<i64: 1, 10>}, {transform_indices = @transform_3, window_bounds = array<i64: 32, 10>}]} {
    %c0 = arith.constant 0 : index
    %c0_0 = arith.constant 0 : index
    %0 = vector.load %arg1[%c0, %c0_0] : memref<32x16xf32, #tpu.memory_space<vmem>>, vector<32x16xf32>
    %c0_1 = arith.constant 0 : index
    %c0_2 = arith.constant 0 : index
    %1 = vector.load %arg2[%c0_1, %c0_2] : memref<16x10xf32, #tpu.memory_space<vmem>>, vector<16x10xf32>
    %cst = arith.constant dense<0.000000e+00> : vector<32x10xf32>
    %2 = tpu.matmul %0, %1, %cst {dimension_numbers = #tpu.dot_dimension_numbers<[1], [0], [0], [1], [0, 0, 1, 1], [], []>} : vector<32x16xf32>, vector<16x10xf32>, vector<32x10xf32> -> vector<32x10xf32>
    %c0_3 = arith.constant 0 : index
    %c0_4 = arith.constant 0 : index
    %3 = vector.load %arg3[%c0_3, %c0_4] : memref<1x10xf32, #tpu.memory_space<vmem>>, vector<1x10xf32>
    %4 = vector.broadcast %3 : vector<1x10xf32> to vector<32x10xf32>
    %5 = arith.addf %2, %4 : vector<32x10xf32>
    %c0_5 = arith.constant 0 : index
    %c0_6 = arith.constant 0 : index
    %6 = vector.load %arg4[%c0_5, %c0_6] : memref<32x10xf32, #tpu.memory_space<vmem>>, vector<32x10xf32>
    tpu.vector_store %arg4[%c0_5, %c0_6], %5 {strides = array<i32>} : memref<32x10xf32, #tpu.memory_space<vmem>>, vector<32x10xf32>,
    return
  }
  func.func @transform_0(%arg0: i32) -> (i32, i32) {
    %c0_i32 = arith.constant 0 : i32
    %c0_i32_0 = arith.constant 0 : i32
    return %arg0, %c0_i32 : i32, i32
  }
  func.func @transform_1(%arg0: i32) -> (i32, i32) {
    %c0_i32 = arith.constant 0 : i32
    %c0_i32_0 = arith.constant 0 : i32
    %c0_i32_1 = arith.constant 0 : i32
    return %c0_i32, %c0_i32_0 : i32, i32
  }
  func.func @transform_2(%arg0: i32) -> (i32, i32) {
    %c0_i32 = arith.constant 0 : i32
    %c0_i32_0 = arith.constant 0 : i32
    %c0_i32_1 = arith.constant 0 : i32
    return %c0_i32, %c0_i32_0 : i32, i32
  }
  func.func @transform_3(%arg0: i32) -> (i32, i32) {
    %c0_i32 = arith.constant 0 : i32
    %c0_i32_0 = arith.constant 0 : i32
    return %arg0, %c0_i32 : i32, i32
  }
}

</mosaic_0001>

<bundles_post_ra>
// kernel: classifier_forward_fused.1
= control target key start
LH: loop header
LB: loop body
LE: loop exit
PB: predicated region body
PF: predicated region fallthrough
CT: control target
= control target key end

     0   :  { %s345_s12 = smov 0   ;;  %s371_s0 = inlined_call_operand.vmem [shape: f32[64,16], index: 0, kind: input, shape index: {}]   ;;  %s372_s1 = inlined_call_operand.vmem [shape: f32[16,10], index: 1, kind: input, shape index: {}]   ;;  %s373_s2 = inlined_call_operand.vmem [shape: f32[1,10], index: 2, kind: input, shape index: {}]   ;;  %s374_s3 = inlined_call_operand.vmem [shape: f32[64,10], index: 3, kind: output, shape index: {}]  }
   0x1 LB: > { %s287_s13 = sadd.s32 4294967295, %s323_s12   ;;  %p291_p0 = scmp.ge.s32.totalorder %s323_s12, 1  ;;  %s323_s12 = sphi %s345_s12, %s13_s12  }
   0x2   : > { %p138_p1 = scmp.lt.s32.totalorder %s323_s12, 3 }
   0x4   : > { %p139_p2 = pnand %p291_p0, %p138_p1 }
   0x5   : > { %s292_s18 = sshll.u32 (!%p139_p2), %s287_s13, 2 }
   0x6   : > { %142 = sbr.rel (%p139_p2) target bundleno = 152 (0x98), region = 32  ;;  %p163_p3 = scmp.lt.s32.totalorder (!%p139_p2), %s292_s18, 7 }
   0xb   : > { %v179_v0 = vld [vmem:[%s372_s1 + $0x8] sm:$0xff]  ;;  %v178_v1 = vld [vmem:[%s372_s1] sm:$0xff]  ;;  %s376_s18 = smov (!%p163_p3, %s292_s18), 7  ;;  %vm184_vm0 = vcmask 130048   ;;  %vm226_vm1 = vcmask 80896  }
   0xc   : > { %303 = vmatpush.msra.mxu2 %v179_v0  ;;  %304 = vmatpush.msra.mxu3 %v179_v0  ;;  %s293_s19 = sshll.u32 %s376_s18, 3  ;;  %v316_v6 = vld [vmem:[%s373_s2] ss:$0 sm:$0xff] }
   0xd   : > { %211 = vmatpush.msra.mxu0 %v179_v0  ;;  %302 = vmatpush.msra.mxu1 %v179_v0  ;;  %s166_s22 = scalar_lea.vmem %s371_s0, %s293_s19  ;;  %s172_s27 = scalar_lea.vmem %s374_s3, %s293_s19 }
   0xe   : > { %306 = vmatpush.msra.mxu2 %v178_v1  ;;  %307 = vmatpush.msra.mxu3 %v178_v1  ;;  %v176_v2 = vld [vmem:[%s166_s22 + $0x10] sm:$0xff]  ;;  %v177_v3 = vld [vmem:[%s166_s22 + $0x18] sm:$0xff]  ;;  %v174_v4 = vld [vmem:[%s166_s22] sm:$0xff] }
   0xf   : > { %212 = vmatpush.msra.mxu0 %v178_v1  ;;  %305 = vmatpush.msra.mxu1 %v178_v1  ;;  %v175_v5 = vld [vmem:[%s166_s22 + $0x8] sm:$0xff] }
  0x10   : > { %298 = vmatmul.msk.f32.vlgmr.msra.gmra.mxu2 %vm184_vm0, %v176_v2  ;;  %299 = vmatmul.msk.f32.vlgmr.msra.gmra.mxu3 %vm184_vm0, %v177_v3 }
  0x11   : > { %296 = vmatmul.msk.f32.vlgmr.msra.gmra.mxu0 %vm184_vm0, %v174_v4  ;;  %297 = vmatmul.msk.f32.vlgmr.msra.gmra.mxu1 %vm184_vm0, %v175_v5 }
  0x8e   : > { %v214_v7 = vpop.f32.mrf.mxu0  ;;  %v217_v8 = vpop.f32.mrf.mxu1 }
  0x8f   : > { %v215_v9 = vadd.f32 %v316_v6, %v214_v7  ;;  %v218_v10 = vadd.f32 %v316_v6, %v217_v8 }
  0x91   : > { %227 = vst.msk [vmem:[%s172_s27] sm:$0xff] %vm226_vm1, %v215_v9 }
  0x92   : > { %228 = vst.msk [vmem:[%s172_s27 + $0x8] sm:$0xff] %vm226_vm1, %v218_v10 }
  0x93   : > { %v220_v11 = vpop.f32.mrf.mxu2  ;;  %v223_v12 = vpop.f32.mrf.mxu3 }
  0x94   : > { %v221_v13 = vadd.f32 %v316_v6, %v220_v11  ;;  %v224_v14 = vadd.f32 %v316_v6, %v223_v12 }
  0x96   : > { %229 = vst.msk [vmem:[%s172_s27 + $0x10] sm:$0xff] %vm226_vm1, %v221_v13 }
  0x97   : > { %230 = vst.msk [vmem:[%s172_s27 + $0x18] sm:$0xff] %vm226_vm1, %v224_v14 }
  0x98 PF: > { %s13_s12 = sadd.s32 1, %s323_s12  }
  0x99   : > { %p10_p4 = scmp.ge.s32.totalorder %s13_s12, 4  }
  0x9b   :  { %12 = sbr.rel (!%p10_p4) target bundleno = 1 (0x1), region = 62 }

</bundles_post_ra>
